<compile_context>
chip_gen: v5e
topology: v5e:2x2
jax: 0.10.0
libtpu: 0.0.40
codegen_flags: <defaults>
</compile_context>

<pallas_src>
import functools
import numpy as np
import jax
import jax.numpy as jnp
from jax import lax
from jax.experimental import pallas as pl
from jax.experimental.pallas import tpu as pltpu

EPS = 1e-8           # PixelwiseNorm alpha
LRELU_SLOPE = 0.2
FEAT = 64            # ProGANGenerator hard-codes 64 feature channels


def _round_up(x, m):
    return ((x + m - 1) // m) * m


# ---------------------------------------------------------------------------
# Host-side constant 0/1 matrices (built once per spatial size, tiny)
# ---------------------------------------------------------------------------

@functools.lru_cache(maxsize=None)
def _expand_matrix(h_in, w_in, src_rp, upsample):
    """0/1 matrix mapping a flat source activation (compact or row-padded) to the
    zero-padded (and optionally 2x nearest-upsampled) flat layout used by the
    in-kernel 3x3 conv.  Rows beyond the padded extent are zero slack rows."""
    hb, wb = (2 * h_in, 2 * w_in) if upsample else (h_in, w_in)
    wp = wb + 2
    p = (hb + 2) * wp
    p_alloc = _round_up(p + 2, 8)          # slack so corner taps never read OOB
    src_stride = (w_in + 2) if src_rp else w_in
    s = h_in * src_stride
    e = np.zeros((p_alloc, s), np.float32)
    for i in range(hb):
        for j in range(wb):
            si, sj = (i // 2, j // 2) if upsample else (i, j)
            e[(i + 1) * wp + (j + 1), si * src_stride + sj] = 1.0
    return jnp.asarray(e), hb, wb, p_alloc


@functools.lru_cache(maxsize=None)
def _junk_mask(hb, wb):
    """(M, 1) mask zeroing the two junk columns of a row-padded activation."""
    wp = wb + 2
    m = np.zeros((hb * wp, 1), np.float32)
    for h in range(hb):
        m[h * wp:h * wp + wb, 0] = 1.0
    return jnp.asarray(m)


@functools.lru_cache(maxsize=None)
def _select_matrix(hb, wb):
    """(Hb*Wb, Hb*(Wb+2)) 0/1 matrix compacting a row-padded activation."""
    wp = wb + 2
    sel = np.zeros((hb * wb, hb * wp), np.float32)
    for i in range(hb):
        for j in range(wb):
            sel[i * wb + j, i * wp + j] = 1.0
    return jnp.asarray(sel)


@functools.lru_cache(maxsize=None)
def _upsample_select_matrix(hs, ws):
    """(4*Hs*Ws, Hs*(Ws+2)) 0/1 matrix: nearest 2x upsample of a row-padded small
    activation straight into the compact big layout (used for the residual RGB)."""
    hb, wb = 2 * hs, 2 * ws
    wps = ws + 2
    u = np.zeros((hb * wb, hs * wps), np.float32)
    for i in range(hb):
        for j in range(wb):
            u[i * wb + j, (i // 2) * wps + (j // 2)] = 1.0
    return jnp.asarray(u)


# ---------------------------------------------------------------------------
# In-kernel helpers
# ---------------------------------------------------------------------------

def _conv3x3_taps(pad_ref, w_ref, m, wp, c):
    """3x3 conv as 9 accumulating (M, C) @ (C, Cout) MXU matmuls over pl.ds-shifted
    views of the VMEM-resident padded activation (no HBM im2col)."""
    acc = None
    for dh in range(3):
        for dw in range(3):
            xs = pad_ref[pl.ds(dh * wp + dw, m), :]
            ws = w_ref[pl.ds((dh * 3 + dw) * c, c), :]
            t = jnp.dot(xs, ws, preferred_element_type=jnp.float32)
            acc = t if acc is None else acc + t
    return acc


def _lrelu_pnorm(y):
    y = jnp.where(y >= 0.0, y, LRELU_SLOPE * y)
    return y * lax.rsqrt(jnp.mean(y * y, axis=-1, keepdims=True) + EPS)


# ---------------------------------------------------------------------------
# Pallas kernels
# ---------------------------------------------------------------------------

def _init_latent_kernel(z_ref, w_ref, b_ref, o_ref):
    """PixelwiseNorm(z) -> ConvTranspose2d(L->64, 4x4 on a 1x1 input) as matmul
    -> bias -> LeakyReLU."""
    z = z_ref[...]
    z = z * lax.rsqrt(jnp.mean(z * z, axis=1, keepdims=True) + EPS)
    y = jnp.dot(z, w_ref[...], preferred_element_type=jnp.float32) + b_ref[...]
    o_ref[...] = jnp.where(y >= 0.0, y, LRELU_SLOPE * y)


def _make_single_conv_kernel(hb, wb, c):
    """conv3x3 + bias + LeakyReLU + PixelwiseNorm on a VMEM-resident padded tile."""
    wp = wb + 2
    m = hb * wp

    def kernel(e_ref, x_ref, w_ref, b_ref, o_ref, xpad_ref):
        # zero-padding via the constant expand matmul (fills slack rows with zeros too)
        xpad_ref[...] = jnp.dot(e_ref[...], x_ref[0],
                                preferred_element_type=jnp.float32)
        y = _conv3x3_taps(xpad_ref, w_ref, m, wp, c) + b_ref[...]
        o_ref[0] = _lrelu_pnorm(y)          # row-padded output (junk cols ignored later)

    return kernel


def _make_general_block_kernel(hb, wb, c):
    """GenGeneralBlock fully fused: 2x nearest upsample + conv1 + conv2
    (bias/LeakyReLU/PixelwiseNorm each); intermediate activation stays in VMEM."""
    wp = wb + 2
    m = hb * wp

    def kernel(e_ref, mask_ref, x_ref, w1_ref, b1_ref, w2_ref, b2_ref,
               o_ref, xpad_ref, pad2_ref):
        # nearest 2x upsample + zero-padding, fused into one expand matmul
        xpad_ref[...] = jnp.dot(e_ref[...], x_ref[0],
                                preferred_element_type=jnp.float32)
        y1 = _lrelu_pnorm(_conv3x3_taps(xpad_ref, w1_ref, m, wp, c) + b1_ref[...])

        # build conv2's zero-padded input in VMEM: zero borders, then insert the masked
        # conv1 output shifted by one padded row + one column.
        pad2_ref[...] = jnp.zeros_like(pad2_ref)
        pad2_ref[pl.ds(wb + 3, m), :] = y1 * mask_ref[...]

        y2 = _lrelu_pnorm(_conv3x3_taps(pad2_ref, w2_ref, m, wp, c) + b2_ref[...])
        o_ref[0] = y2

    return kernel


def _rgb_blend_tanh_kernel(sel_ref, u_ref, y_ref, yres_ref,
                           whi_ref, bhi_ref, wlo_ref, blo_ref, o_ref):
    """Fused to_RGB tail: 1x1 conv (hi), 1x1 conv (lo) + nearest 2x upsample,
    fade-in blend (alpha pre-folded into the weights) and tanh."""
    hi = jnp.dot(y_ref[0], whi_ref[...], preferred_element_type=jnp.float32)
    hi = jnp.dot(sel_ref[...], hi, preferred_element_type=jnp.float32) + bhi_ref[...]
    lo = jnp.dot(yres_ref[0], wlo_ref[...], preferred_element_type=jnp.float32)
    lo = jnp.dot(u_ref[...], lo, preferred_element_type=jnp.float32) + blo_ref[...]
    o_ref[0] = jnp.tanh(hi + lo)


# ---------------------------------------------------------------------------
# Pallas wrappers
# ---------------------------------------------------------------------------

def init_block_projection(z, w_k, b_k):
    """z: (B, L) -> (B, 4*4*FEAT) flat NHWC (kh, kw, oc) ordering."""
    B = z.shape[0]
    return pl.pallas_call(
        _init_latent_kernel,
        out_shape=jax.ShapeDtypeStruct((B, w_k.shape[1]), jnp.float32),
    )(z, w_k, b_k)


def conv3x3_single(x, w_k, b_k, h_in, w_in, src_rp):
    """Single conv3x3 + lrelu + pnorm.  x: (B, S, C) flat; returns row-padded output."""
    B, s, c = x.shape
    e, hb, wb, p_alloc = _expand_matrix(h_in, w_in, src_rp, False)
    wp = wb + 2
    m = hb * wp
    out = pl.pallas_call(
        _make_single_conv_kernel(hb, wb, c),
        out_shape=jax.ShapeDtypeStruct((B, m, c), jnp.float32),
        grid=(B,),
        in_specs=[
            pl.BlockSpec((p_alloc, s), lambda b: (0, 0)),
            pl.BlockSpec((1, s, c), lambda b: (b, 0, 0)),
            pl.BlockSpec((9 * c, c), lambda b: (0, 0)),
            pl.BlockSpec((1, c), lambda b: (0, 0)),
        ],
        out_specs=pl.BlockSpec((1, m, c), lambda b: (b, 0, 0)),
        scratch_shapes=[pltpu.VMEM((p_alloc, c), jnp.float32)],
        compiler_params=pltpu.CompilerParams(dimension_semantics=("parallel",)),
    )(e, x, w_k, b_k)
    return out, hb, wb


def general_block(x, w1, b1, w2, b2, h_in, w_in):
    """GenGeneralBlock: upsample2x + (conv3x3 + lrelu + pnorm) x2, one pallas_call."""
    B, s, c = x.shape
    e, hb, wb, p_alloc = _expand_matrix(h_in, w_in, True, True)
    mask = _junk_mask(hb, wb)
    wp = wb + 2
    m = hb * wp
    out = pl.pallas_call(
        _make_general_block_kernel(hb, wb, c),
        out_shape=jax.ShapeDtypeStruct((B, m, c), jnp.float32),
        grid=(B,),
        in_specs=[
            pl.BlockSpec((p_alloc, s), lambda b: (0, 0)),
            pl.BlockSpec((m, 1), lambda b: (0, 0)),
            pl.BlockSpec((1, s, c), lambda b: (b, 0, 0)),
            pl.BlockSpec((9 * c, c), lambda b: (0, 0)),
            pl.BlockSpec((1, c), lambda b: (0, 0)),
            pl.BlockSpec((9 * c, c), lambda b: (0, 0)),
            pl.BlockSpec((1, c), lambda b: (0, 0)),
        ],
        out_specs=pl.BlockSpec((1, m, c), lambda b: (b, 0, 0)),
        scratch_shapes=[pltpu.VMEM((p_alloc, c), jnp.float32),
                        pltpu.VMEM((p_alloc, c), jnp.float32)],
        compiler_params=pltpu.CompilerParams(dimension_semantics=("parallel",)),
    )(e, mask, x, w1, b1, w2, b2)
    return out, hb, wb


def rgb_blend_tanh(y_rp, yres_rp, hb, wb, hs, ws, w_hi, b_hi, w_lo, b_lo):
    """Fused to_RGB tail.  y_rp: (B, Mb, C) row-padded, yres_rp: (B, Ms, C)."""
    B, mb, c = y_rp.shape
    ms = yres_rp.shape[1]
    hw = hb * wb
    ch = w_hi.shape[1]
    sel = _select_matrix(hb, wb)
    u = sel if (hs, ws) == (hb, wb) else _upsample_select_matrix(hs, ws)
    out = pl.pallas_call(
        _rgb_blend_tanh_kernel,
        out_shape=jax.ShapeDtypeStruct((B, hw, ch), jnp.float32),
        grid=(B,),
        in_specs=[
            pl.BlockSpec((hw, mb), lambda b: (0, 0)),
            pl.BlockSpec((hw, ms), lambda b: (0, 0)),
            pl.BlockSpec((1, mb, c), lambda b: (b, 0, 0)),
            pl.BlockSpec((1, ms, c), lambda b: (b, 0, 0)),
            pl.BlockSpec((c, ch), lambda b: (0, 0)),
            pl.BlockSpec((1, ch), lambda b: (0, 0)),
            pl.BlockSpec((c, ch), lambda b: (0, 0)),
            pl.BlockSpec((1, ch), lambda b: (0, 0)),
        ],
        out_specs=pl.BlockSpec((1, hw, ch), lambda b: (b, 0, 0)),
        compiler_params=pltpu.CompilerParams(dimension_semantics=("parallel",)),
    )(sel, u, y_rp, yres_rp, w_hi, b_hi, w_lo, b_lo)
    return out


# ---------------------------------------------------------------------------
# Parameters (deterministic, synthetic; PyTorch layouts)
# ---------------------------------------------------------------------------

def init_params(key, latent_dim, fin_size, channels=3):
    depth = int(np.log2(fin_size / 4))
    keys = iter(jax.random.split(key, 64))

    def nrm(shape, scale=0.1):
        return scale * jax.random.normal(next(keys), shape, jnp.float32)

    return {
        "depth": depth,
        "convT_w": nrm((latent_dim, FEAT, 4, 4)),
        "convT_b": nrm((FEAT,)),
        "init_conv_w": nrm((FEAT, FEAT, 3, 3)),
        "init_conv_b": nrm((FEAT,)),
        "blocks": [
            {"w1": nrm((FEAT, FEAT, 3, 3)), "b1": nrm((FEAT,)),
             "w2": nrm((FEAT, FEAT, 3, 3)), "b2": nrm((FEAT,))}
            for _ in range(depth)
        ],
        "rgb_w": [nrm((channels, FEAT, 1, 1)) for _ in range(depth + 1)],
        "rgb_b": [nrm((channels,)) for _ in range(depth + 1)],
    }


def to_kernel_params(p, latent_dim):
    """Convert PyTorch-layout weights into the matmul operands the kernels expect."""
    def conv3x3_k(w):  # (O, I, 3, 3) -> (9*I, O), row index = (kh*3+kw)*I + ci
        O, I = w.shape[0], w.shape[1]
        return jnp.transpose(w, (2, 3, 1, 0)).reshape(9 * I, O)

    return {
        # (L, O, 4, 4) -> (L, 4*4*O) with flat index (kh*4+kw)*O + oc
        "convT_w": jnp.transpose(p["convT_w"], (0, 2, 3, 1)).reshape(latent_dim, 16 * FEAT),
        "convT_b": jnp.tile(p["convT_b"], 16).reshape(1, 16 * FEAT),
        "init_conv_w": conv3x3_k(p["init_conv_w"]),
        "init_conv_b": p["init_conv_b"].reshape(1, FEAT),
        "blocks": [
            {"w1": conv3x3_k(b["w1"]), "b1": b["b1"].reshape(1, FEAT),
             "w2": conv3x3_k(b["w2"]), "b2": b["b2"].reshape(1, FEAT)}
            for b in p["blocks"]
        ],
        "rgb_w": [jnp.transpose(w[:, :, 0, 0], (1, 0)) for w in p["rgb_w"]],  # (I, O)
        "rgb_b": [b.reshape(1, -1) for b in p["rgb_b"]],
    }


# ---------------------------------------------------------------------------
# ProGANGenerator.forward (Pallas path)
# ---------------------------------------------------------------------------

def progan_forward(kp, z, curr_size, alpha):
    """z: (B, latent_dim) float32 -> image (B, channels, curr_size, curr_size) NCHW."""
    B = z.shape[0]
    # GenInitBlock: pnorm -> convT 4x4 -> lrelu  (kernel 1)
    y = init_block_projection(z, kp["convT_w"], kp["convT_b"])     # (B, 16*FEAT)
    y = y.reshape(B, 16, FEAT)                                     # compact 4x4 NHWC (free view)
    #              -> conv3x3 -> lrelu -> pnorm  (kernel 2, fused)
    y, h, w = conv3x3_single(y, kp["init_conv_w"], kp["init_conv_b"], 4, 4, src_rp=False)

    curr_depth = int(np.log2(curr_size / 4))
    y_res, hs, ws = y, h, w
    for i in range(curr_depth):
        y_res, hs, ws = y, h, w
        blk = kp["blocks"][i]
        y, h, w = general_block(y, blk["w1"], blk["b1"], blk["w2"], blk["b2"], h, w)

    # Fused to_RGB tail; fade-in alpha folded into the 1x1 weights on the host.
    if curr_depth == 0:
        w_hi, b_hi = kp["rgb_w"][0], kp["rgb_b"][0]
        w_lo, b_lo = jnp.zeros_like(w_hi), jnp.zeros_like(b_hi)
        out = rgb_blend_tanh(y, y, h, w, h, w, w_hi, b_hi, w_lo, b_lo)
    else:
        w_hi = kp["rgb_w"][curr_depth] * alpha
        b_hi = kp["rgb_b"][curr_depth] * alpha
        w_lo = kp["rgb_w"][curr_depth - 1] * (1.0 - alpha)
        b_lo = kp["rgb_b"][curr_depth - 1] * (1.0 - alpha)
        out = rgb_blend_tanh(y, y_res, h, w, hs, ws, w_hi, b_hi, w_lo, b_lo)

    out = out.reshape(B, h, w, -1)
    return jnp.transpose(out, (0, 3, 1, 2))  # NHWC -> NCHW (PyTorch convention)


# ---------------------------------------------------------------------------
# Pure-JAX reference (mirrors the PyTorch module) for correctness checking
# ---------------------------------------------------------------------------

def ref_forward(p, z, curr_size, alpha):
    def pnorm(x):
        return x / jnp.sqrt(jnp.mean(x * x, axis=-1, keepdims=True) + EPS)

    def lrelu(x):
        return jnp.where(x >= 0.0, x, LRELU_SLOPE * x)

    def conv(x, w_oihw, b, padding):
        w_hwio = jnp.transpose(w_oihw, (2, 3, 1, 0))
        y = lax.conv_general_dilated(x, w_hwio, (1, 1), padding,
                                     dimension_numbers=("NHWC", "HWIO", "NHWC"))
        return y + b[None, None, None, :]

    def up2(x):
        return jnp.repeat(jnp.repeat(x, 2, axis=1), 2, axis=2)

    zn = pnorm(z)
    y = jnp.einsum("bi,iohw->bhwo", zn, p["convT_w"]) + p["convT_b"][None, None, None, :]
    y = lrelu(y)
    y = pnorm(lrelu(conv(y, p["init_conv_w"], p["init_conv_b"], "SAME")))

    curr_depth = int(np.log2(curr_size / 4))
    y_res = y
    for i in range(curr_depth):
        y_res = y
        y = up2(y)
        blk = p["blocks"][i]
        y = pnorm(lrelu(conv(y, blk["w1"], blk["b1"], "SAME")))
        y = pnorm(lrelu(conv(y, blk["w2"], blk["b2"], "SAME")))

    if curr_depth == 0:
        out = conv(y, p["rgb_w"][0], p["rgb_b"][0], "VALID")
    else:
        a = conv(y, p["rgb_w"][curr_depth], p["rgb_b"][curr_depth], "VALID")
        r = up2(conv(y_res, p["rgb_w"][curr_depth - 1], p["rgb_b"][curr_depth - 1], "VALID"))
        out = a * alpha + r * (1.0 - alpha)

    return jnp.transpose(jnp.tanh(out), (0, 3, 1, 2))


# ---------------------------------------------------------------------------

if __name__ == "__main__":
    B, LATENT, FIN_SIZE, CHANNELS = 2, 32, 16, 3
    CURR_SIZE, ALPHA = 16, 0.7  # full depth (depth=2) -> exercises the fade-in blend path

    key = jax.random.PRNGKey(0)
    pkey, zkey = jax.random.split(key)
    raw = init_params(pkey, LATENT, FIN_SIZE, CHANNELS)
    kp = to_kernel_params(raw, LATENT)
    z = jax.random.normal(zkey, (B, LATENT), jnp.float32)

    out = progan_forward(kp, z, CURR_SIZE, ALPHA)
    out = jax.block_until_ready(out)
    assert out.shape == (B, CHANNELS, CURR_SIZE, CURR_SIZE), out.shape
    assert out.dtype == jnp.float32

    ref = jax.block_until_ready(ref_forward(raw, z, CURR_SIZE, ALPHA))
    # Tolerance covers MXU vs XLA-conv accumulation-order / precision differences.
    np.testing.assert_allclose(np.asarray(out), np.asarray(ref), rtol=5e-3, atol=5e-3)

    print("KERNEL_OK")
</pallas_src>

<mosaic_0001>
module attributes {stable_mosaic.version = 11 : i64} {
  func.func @_init_latent_kernel(%arg0: memref<2x32xf32, #tpu.memory_space<vmem>>, %arg1: memref<32x1024xf32, #tpu.memory_space<vmem>>, %arg2: memref<1x1024xf32, #tpu.memory_space<vmem>>, %arg3: memref<2x1024xf32, #tpu.memory_space<vmem>>) attributes {dimension_semantics = [], scalar_prefetch = 0 : i64, scratch_operands = 0 : i64, tpu.core_type = #tpu.core_type<tc>} {
    %c0 = arith.constant 0 : index
    %c0_0 = arith.constant 0 : index
    %0 = vector.load %arg0[%c0, %c0_0] : memref<2x32xf32, #tpu.memory_space<vmem>>, vector<2x32xf32>
    %1 = arith.mulf %0, %0 : vector<2x32xf32>
    %cst = arith.constant dense<0.000000e+00> : vector<2xf32>
    %2 = vector.multi_reduction <add>, %1, %cst [1] : vector<2x32xf32> to vector<2xf32>
    %3 = vector.shape_cast %2 : vector<2xf32> to vector<2x1xf32>
    %cst_1 = arith.constant 3.200000e+01 : f32
    %4 = vector.broadcast %cst_1 : f32 to vector<2x1xf32>
    %5 = arith.divf %3, %4 : vector<2x1xf32>
    %cst_2 = arith.constant 9.99999993E-9 : f32
    %6 = vector.broadcast %cst_2 : f32 to vector<2x1xf32>
    %7 = arith.addf %5, %6 : vector<2x1xf32>
    %8 = math.rsqrt %7 : vector<2x1xf32>
    %9 = vector.broadcast %8 : vector<2x1xf32> to vector<2x32xf32>
    %10 = arith.mulf %0, %9 : vector<2x32xf32>
    %c0_3 = arith.constant 0 : index
    %c0_4 = arith.constant 0 : index
    %11 = vector.load %arg1[%c0_3, %c0_4] : memref<32x1024xf32, #tpu.memory_space<vmem>>, vector<32x1024xf32>
    %cst_5 = arith.constant dense<0.000000e+00> : vector<2x1024xf32>
    %12 = tpu.matmul %10, %11, %cst_5 {dimension_numbers = #tpu.dot_dimension_numbers<[1], [0], [0], [1], [0, 0, 1, 1], [], []>} : vector<2x32xf32>, vector<32x1024xf32>, vector<2x1024xf32> -> vector<2x1024xf32>
    %c0_6 = arith.constant 0 : index
    %c0_7 = arith.constant 0 : index
    %13 = vector.load %arg2[%c0_6, %c0_7] : memref<1x1024xf32, #tpu.memory_space<vmem>>, vector<1x1024xf32>
    %14 = vector.broadcast %13 : vector<1x1024xf32> to vector<2x1024xf32>
    %15 = arith.addf %12, %14 : vector<2x1024xf32>
    %cst_8 = arith.constant 0.000000e+00 : f32
    %16 = vector.broadcast %cst_8 : f32 to vector<2x1024xf32>
    %17 = arith.cmpf oge, %15, %16 : vector<2x1024xf32>
    %cst_9 = arith.constant 2.000000e-01 : f32
    %18 = vector.broadcast %cst_9 : f32 to vector<2x1024xf32>
    %19 = arith.mulf %18, %15 : vector<2x1024xf32>
    %20 = arith.select %17, %15, %19 : vector<2x1024xi1>, vector<2x1024xf32>
    %c0_10 = arith.constant 0 : index
    %c0_11 = arith.constant 0 : index
    %21 = vector.load %arg3[%c0_10, %c0_11] : memref<2x1024xf32, #tpu.memory_space<vmem>>, vector<2x1024xf32>
    tpu.vector_store %arg3[%c0_10, %c0_11], %20 {strides = array<i32>} : memref<2x1024xf32, #tpu.memory_space<vmem>>, vector<2x1024xf32>,
    return
  }
}

</mosaic_0001>

<bundles_post_ra>
// kernel: tpu_custom_call.1
= control target key start
LH: loop header
LB: loop body
LE: loop exit
PB: predicated region body
PF: predicated region fallthrough
CT: control target
= control target key end

     0   :  { %8 = vsyncpa [#allocation3], 0  ;;  %s539_s0 = inlined_call_operand.hbm [shape: f32[2,32], index: 0, kind: input, shape index: {}]   ;;  %s540_s1 = inlined_call_operand.hbm [shape: f32[32,1024], index: 1, kind: input, shape index: {}]   ;;  %s541_s2 = inlined_call_operand.hbm [shape: f32[1,1024], index: 2, kind: input, shape index: {}]   ;;  %s542_s3 = inlined_call_operand.hbm [shape: f32[2,1024], index: 3, kind: output, shape index: {}]  }
   0x1   :  { %9 = vsyncpa [#allocation6], 0  ;;  %s26_s14 = sshll.u32 %s540_s1, 4  ;;  %s27_s14 = int_to_ptr.hbm [resolvable:$true] %s26_s14 }
   0x2   :  { %10 = vsyncpa [#allocation4], 0  ;;  %s488_s15 = smov [#allocation5]   ;;  %s16_s19 = sshll.u32 %s539_s0, 4  ;;  %s17_s19 = int_to_ptr.hbm [resolvable:$true] %s16_s19 }
   0x3   :  { %s28_s16 = sshll.u32 %s488_s15, 4  ;;  %s489_s20 = smov 1024   ;;  %s29_s16 = int_to_ptr.vmem [resolvable:$true] %s28_s16 }
   0x4   :  { %s490_s21 = smov 64   ;;  %s491_s22 = smov [#allocation2]  }
   0x5   :  { %34 = dma.hbm_to_vmem [thread:$0]  %s27_s14, 4096, %s29_s16, [#allocation6], %s489_s20, %s489_s20, %s490_s21  }
   0x6   :  { %s18_s23 = sshll.u32 %s491_s22, 4  ;;  %s40_s26 = sshll.u32 %s541_s2, 4  ;;  %s19_s23 = int_to_ptr.vmem [resolvable:$true] %s18_s23  ;;  %s41_s26 = int_to_ptr.hbm [resolvable:$true] %s40_s26 }
   0x7   :  { %21 = dma.hbm_to_vmem [thread:$0]  %s17_s19, 32, %s19_s23, [#allocation3]  }
   0x8   :  { %s492_s1 = smov [#allocation7]  }
   0x9   :  { %s42_s27 = sshll.u32 %s492_s1, 4  ;;  %s43_s27 = int_to_ptr.vmem [resolvable:$true] %s42_s27 }
   0xa   :  { %45 = dma.hbm_to_vmem [thread:$0]  %s41_s26, 128, %s43_s27, [#allocation6]  }
   0xb   :  { %482 = dma.done.wait [#allocation3], 32  }
   0xc   :  { %483 = vsyncadd [#allocation3], 4294967264 }
   0xd   :  { %484 = dma.done.wait [#allocation6], 4224  }
   0xe   :  { %485 = vsyncadd [#allocation6], 4294963072  ;;  %v524_v0 = vld [vmem:[#allocation2] sm:$0x3]  ;;  %vm60_vm0 = vcmask 254976   ;;  %v493_v3 = vmov 32.0  }
   0xf   :  { %v59_v1 = vmul.f32 %v524_v0, %v524_v0  ;;  %382 = vrcp.f32 %v493_v3  ;;  %v108_v6 = vld [vmem:[#allocation5 + $0xc0] sm:$0xff]  ;;  %v109_v7 = vld [vmem:[#allocation5 + $0xc8] sm:$0xff]  ;;  %v110_v8 = vld [vmem:[#allocation5 + $0xd0] sm:$0xff]  ;;  %vm134_vm5 = vcmask 261120   ;;  %vm336_vm7 = vcmask 1041408   ;;  %s494_s0 = smov [#allocation8]  }
  0x10   :  { %150 = vmatpush.msra.mxu0 %v108_v6  ;;  %170 = vmatpush.msra.mxu1 %v109_v7  ;;  %v111_v10 = vld [vmem:[#allocation5 + $0xd8] sm:$0xff]  ;;  %v100_v11 = vld [vmem:[#allocation5 + $0x80] sm:$0xff]  ;;  %v101_v12 = vld [vmem:[#allocation5 + $0x88] sm:$0xff]  ;;  %vm338_vm11 = vcmask 1045508   ;;  %vm340_vm12 = vcmask 1043456   ;;  %s354_s2 = sshll.u32 %s494_s0, 4  ;;  %s355_s2 = int_to_ptr.vmem [resolvable:$true] %s354_s2 }
  0x11   :  { %v61_v2 = vsel %vm60_vm0, %v59_v1, 0.0  ;;  %190 = vmatpush.msra.mxu2 %v110_v8  ;;  %210 = vmatpush.msra.mxu3 %v111_v10  ;;  %v102_v13 = vld [vmem:[#allocation5 + $0x90] sm:$0xff]  ;;  %v103_v14 = vld [vmem:[#allocation5 + $0x98] sm:$0xff]  ;;  %v92_v15 = vld [vmem:[#allocation5 + $0x40] sm:$0xff]  ;;  %s356_s30 = sshll.u32 %s542_s3, 4  ;;  %s357_s30 = int_to_ptr.hbm [resolvable:$true] %s356_s30 }
  0x12   :  { %62 = vadd.xlane.f32.xlu0 %v61_v2  ;;  %151 = vmatpush.msra.mxu0 %v100_v11  ;;  %v93_v16 = vld [vmem:[#allocation5 + $0x48] sm:$0xff]  ;;  %v94_v17 = vld [vmem:[#allocation5 + $0x50] sm:$0xff]  ;;  %v95_v19 = vld [vmem:[#allocation5 + $0x58] sm:$0xff] }
  0x13   :  { %171 = vmatpush.msra.mxu1 %v101_v12  ;;  %191 = vmatpush.msra.mxu2 %v102_v13  ;;  %v84_v20 = vld [vmem:[#allocation5] sm:$0xff]  ;;  %v85_v21 = vld [vmem:[#allocation5 + $0x8] sm:$0xff]  ;;  %v86_v22 = vld [vmem:[#allocation5 + $0x10] sm:$0xff] }
  0x14   :  { %211 = vmatpush.msra.mxu3 %v103_v14  ;;  %152 = vmatpush.msra.mxu0 %v92_v15  ;;  %v87_v23 = vld [vmem:[#allocation5 + $0x18] sm:$0xff]  ;;  %v114_v25 = vld [vmem:[#allocation5 + $0xf0] sm:$0xff]  ;;  %v112_v27 = vld [vmem:[#allocation5 + $0xe0] sm:$0xff] }
  0x15   :  { %v383_v4 = vpop.eup %382  ;;  %172 = vmatpush.msra.mxu1 %v93_v16  ;;  %192 = vmatpush.msra.mxu2 %v94_v17  ;;  %v115_v26 = vld [vmem:[#allocation5 + $0xf8] sm:$0xff]  ;;  %v113_v28 = vld [vmem:[#allocation5 + $0xe8] sm:$0xff]  ;;  %v106_v29 = vld [vmem:[#allocation5 + $0xb0] sm:$0xff] }
  0x16   :  { %v65_v5 = vmul.f32 32.0, %v383_v4  ;;  %212 = vmatpush.msra.mxu3 %v95_v19  ;;  %153 = vmatpush.msra.mxu0 %v84_v20  ;;  %vm69_vm1 = vweird.f32 %v383_v4  ;;  %v107_v30 = vld [vmem:[#allocation5 + $0xb8] sm:$0xff]  ;;  %v104_v31 = vld [vmem:[#allocation5 + $0xa0] sm:$0xff]  ;;  %v105_v32 = vld [vmem:[#allocation5 + $0xa8] sm:$0xff] }
  0x17   :  { %173 = vmatpush.msra.mxu1 %v85_v21  ;;  %193 = vmatpush.msra.mxu2 %v86_v22  ;;  %v98_v33 = vld [vmem:[#allocation5 + $0x70] sm:$0xff]  ;;  %v99_v34 = vld [vmem:[#allocation5 + $0x78] sm:$0xff]  ;;  %v96_v35 = vld [vmem:[#allocation5 + $0x60] sm:$0xff] }
  0x18   :  { %v66_v9 = vsub.f32 1.0, %v65_v5  ;;  %213 = vmatpush.msra.mxu3 %v87_v23  ;;  %230 = vmatpush.msrb.mxu0 %v112_v27  ;;  %v97_v36 = vld [vmem:[#allocation5 + $0x68] sm:$0xff]  ;;  %v90_v38 = vld [vmem:[#allocation5 + $0x30] sm:$0xff]  ;;  %v91_v39 = vld [vmem:[#allocation5 + $0x38] sm:$0xff] }
  0x19   :  { %270 = vmatpush.msrb.mxu2 %v114_v25  ;;  %250 = vmatpush.msrb.mxu1 %v113_v28  ;;  %v88_v40 = vld [vmem:[#allocation5 + $0x20] sm:$0xff]  ;;  %v89_v41 = vld [vmem:[#allocation5 + $0x28] sm:$0xff] }
  0x1a   :  { %v67_v18 = vmul.f32 %v383_v4, %v66_v9  ;;  %290 = vmatpush.msrb.mxu3 %v115_v26  ;;  %231 = vmatpush.msrb.mxu0 %v104_v31  ;;  %v116_v53 = vld [vmem:[#allocation7] sm:$0xff] }
  0x1b   :  { %271 = vmatpush.msrb.mxu2 %v106_v29  ;;  %251 = vmatpush.msrb.mxu1 %v105_v32  ;;  %v119_v54 = vperm.slane %v116_v53, 1  ;;  %v118_v57 = vperm.slane %v116_v53, 0  ;;  %v120_v60 = vperm.slane %v116_v53, 2  ;;  %v121_v61 = vperm.slane %v116_v53, 3 }
  0x1c   :  { %v68_v24 = vadd.f32 %v383_v4, %v67_v18  ;;  %291 = vmatpush.msrb.mxu3 %v107_v30  ;;  %232 = vmatpush.msrb.mxu0 %v96_v35  ;;  %v123_v63 = vperm.slane %v116_v53, 5  ;;  %v122_v5 = vperm.slane %v116_v53, 4  ;;  %v124_v9 = vperm.slane %v116_v53, 6 }
  0x1d   :  { %272 = vmatpush.msrb.mxu2 %v98_v33  ;;  %252 = vmatpush.msrb.mxu1 %v97_v36  ;;  %v125_v14 = vperm.slane %v116_v53, 7 }
  0x1e   :  { %v70_v37 = vsel %vm69_vm1, %v383_v4, %v68_v24  ;;  %292 = vmatpush.msrb.mxu3 %v99_v34  ;;  %233 = vmatpush.msrb.mxu0 %v88_v40 }
  0x1f   :  { %273 = vmatpush.msrb.mxu2 %v90_v38  ;;  %253 = vmatpush.msrb.mxu1 %v89_v41 }
  0x20   :  { %293 = vmatpush.msrb.mxu3 %v91_v39 }
  0x85   :  { %v63_v42 = vpop.xlane.xlu0 %62 }
  0x86   :  { %v71_v43 = vmul.f32 %v70_v37, %v63_v42 }
  0x88   :  { %v72_v44 = vadd.f32 1e-08, %v71_v43 }
  0x8a   :  { %384 = vrsqrt.f32 %v72_v44  ;;  %vm79_vm3 = vweird.f32 %v72_v44 }
  0x90   :  { %v385_v45 = vpop.eup %384 }
  0x91   :  { %v74_v46 = vmul.f32 %v385_v45, %v72_v44  ;;  %vm80_vm2 = vweird.f32 %v385_v45 }
  0x92   :  { %vm81_vm4 = vmor %vm79_vm3, %vm80_vm2 }
  0x93   :  { %v75_v47 = vmul.f32 %v385_v45, %v74_v46 }
  0x95   :  { %v76_v48 = vmul.f32 0.5, %v75_v47 }
  0x97   :  { %v77_v49 = vsub.f32 1.5, %v76_v48 }
  0x99   :  { %v78_v50 = vmul.f32 %v385_v45, %v77_v49 }
  0x9b   :  { %v82_v51 = vsel %vm81_vm4, %v385_v45, %v78_v50 }
  0x9c   :  { %v83_v52 = vmul.f32 %v82_v51, %v524_v0 }
  0x9e   :  { %367 = vmatmul.msk.f32.vlgmr.msra.gmra.mxu0 %vm134_vm5, %v83_v52  ;;  %368 = vmatmul.msk.f32.vlgmr.msra.gmra.mxu1 %vm134_vm5, %v83_v52 }
  0x9f   :  { %369 = vmatmul.msk.f32.vlgmr.msra.gmra.mxu2 %vm134_vm5, %v83_v52  ;;  %370 = vmatmul.msk.f32.vlgmr.msra.gmra.mxu3 %vm134_vm5, %v83_v52 }
  0xa6   :  { %371 = vmatmul.msk.f32.vlgmr.msrb.gmra.mxu0 %vm134_vm5, %v83_v52  ;;  %372 = vmatmul.msk.f32.vlgmr.msrb.gmra.mxu1 %vm134_vm5, %v83_v52 }
  0xa7   :  { %373 = vmatmul.msk.f32.vlgmr.msrb.gmra.mxu2 %vm134_vm5, %v83_v52  ;;  %374 = vmatmul.msk.f32.vlgmr.msrb.gmra.mxu3 %vm134_vm5, %v83_v52 }
 0x11b   :  { %v155_v55 = vpop.f32.mrf.mxu0  ;;  %v175_v56 = vpop.f32.mrf.mxu1 }
 0x11c   :  { %v176_v58 = vadd.f32 %v175_v56, %v119_v54  ;;  %v156_v62 = vadd.f32 %v155_v55, %v118_v57 }
 0x11e   :  { %v307_v59 = vmul.f32 0.2, %v176_v58  ;;  %vm299_vm6 = vcmp.ge.f32.partialorder %v176_v58, 0.0  ;;  %v306_v7 = vmul.f32 0.2, %v156_v62  ;;  %vm298_vm10 = vcmp.ge.f32.partialorder %v156_v62, 0.0 }
 0x120   :  { %v315_v2 = vsel %vm299_vm6, %v176_v58, %v307_v59  ;;  %v314_v21 = vsel %vm298_vm10, %v156_v62, %v306_v7 }
 0x121   :  { %v330_v13 = vrot.slane %v315_v2, 6 }
 0x122   :  { %v195_v0 = vpop.f32.mrf.mxu2  ;;  %v215_v1 = vpop.f32.mrf.mxu3 }
 0x123   :  { %v196_v3 = vadd.f32 %v195_v0, %v120_v60  ;;  %v216_v4 = vadd.f32 %v215_v1, %v121_v61  ;;  %v255_v6 = vpop.f32.mrf.mxu1  ;;  %v235_v12 = vpop.f32.mrf.mxu0  ;;  %v337_v24 = vsel %vm336_vm7, %v314_v21, %v330_v13 }
 0x124   :  { %v256_v8 = vadd.f32 %v255_v6, %v123_v63  ;;  %v236_v20 = vadd.f32 %v235_v12, %v122_v5 }
 0x125   :  { %vm300_vm8 = vcmp.ge.f32.partialorder %v196_v3, 0.0  ;;  %v308_v10 = vmul.f32 0.2, %v196_v3  ;;  %vm301_vm9 = vcmp.ge.f32.partialorder %v216_v4, 0.0  ;;  %v309_v11 = vmul.f32 0.2, %v216_v4 }
 0x126   :  { %v311_v17 = vmul.f32 0.2, %v256_v8  ;;  %vm303_vm13 = vcmp.ge.f32.partialorder %v256_v8, 0.0  ;;  %v310_v30 = vmul.f32 0.2, %v236_v20  ;;  %vm302_vm0 = vcmp.ge.f32.partialorder %v236_v20, 0.0 }
 0x127   :  { %v316_v15 = vsel %vm300_vm8, %v196_v3, %v308_v10  ;;  %v317_v16 = vsel %vm301_vm9, %v216_v4, %v309_v11 }
 0x128   :  { %v331_v18 = vrot.slane %v316_v15, 4  ;;  %v332_v19 = vrot.slane %v317_v16, 2  ;;  %v319_v26 = vsel %vm303_vm13, %v256_v8, %v311_v17  ;;  %v318_v38 = vsel %vm302_vm0, %v236_v20, %v310_v30 }
 0x129   :  { %v333_v33 = vrot.slane %v319_v26, 6 }
 0x12a   :  { %v275_v22 = vpop.f32.mrf.mxu2  ;;  %v295_v23 = vpop.f32.mrf.mxu3  ;;  %v339_v25 = vsel %vm338_vm11, %v331_v18, %v332_v19 }
 0x12b   :  { %v276_v27 = vadd.f32 %v275_v22, %v124_v9  ;;  %v296_v28 = vadd.f32 %v295_v23, %v125_v14  ;;  %v341_v29 = vsel %vm340_vm12, %v337_v24, %v339_v25  ;;  %v342_v39 = vsel %vm336_vm7, %v318_v38, %v333_v33 }
 0x12c   :  { %347 = vst [vmem:[#allocation8] sm:$0xff] %v341_v29 }
 0x12d   :  { %vm304_vm14 = vcmp.ge.f32.partialorder %v276_v27, 0.0  ;;  %v312_v31 = vmul.f32 0.2, %v276_v27  ;;  %vm305_vm15 = vcmp.ge.f32.partialorder %v296_v28, 0.0  ;;  %v313_v32 = vmul.f32 0.2, %v296_v28 }
 0x12f   :  { %v320_v34 = vsel %vm304_vm14, %v276_v27, %v312_v31  ;;  %v321_v35 = vsel %vm305_vm15, %v296_v28, %v313_v32 }
 0x130   :  { %v334_v36 = vrot.slane %v320_v34, 4  ;;  %v335_v37 = vrot.slane %v321_v35, 2 }
 0x132   :  { %v343_v40 = vsel %vm338_vm11, %v334_v36, %v335_v37 }
 0x133   :  { %v344_v41 = vsel %vm340_vm12, %v342_v39, %v343_v40 }
 0x134   :  { %348 = vst [vmem:[#allocation8 + $0x8] sm:$0xff] %v344_v41 }
 0x135   :  { %359 = dma.vmem_to_hbm [thread:$0]  %s355_s2, 256, %s357_s30, [#allocation4]  }
 0x136   :  { %486 = dma.done.wait [#allocation4], 256  }
 0x137   :  { %487 = vsyncadd [#allocation4], 4294967040 }
 0x138   :  { %364 = vsyncpa [#allocation3], 1 }
 0x139   :  { %365 = vsyncpa [#allocation6], 1 }
 0x13a   :  { %366 = vsyncpa [#allocation4], 1 }

</bundles_post_ra>
